<compile_context>
chip_gen: v5e
topology: v5e:2x2
jax: 0.10.0
libtpu: 0.0.40
codegen_flags: <defaults>
</compile_context>

<pallas_src>
import functools

import jax
import jax.numpy as jnp
from jax.experimental import pallas as pl
from jax.experimental.pallas import tpu as pltpu


def _round_up(x, m):
    return ((x + m - 1) // m) * m


def _vmem_limit(bytes_needed):
    # Explicit scoped-VMEM budget from the double-buffered working set with
    # 2x headroom, capped at 64 MiB so the same budget is valid on v7x
    # (64 MiB physical) as well as v5e/v6e.
    return int(min(max(2 * bytes_needed, 32 * 1024 * 1024), 64 * 1024 * 1024))


# ---------------------------------------------------------------------------
# Kernel 1: feature transform  Z = Xs @ W   (hoisted out of the aggregation)
# ---------------------------------------------------------------------------
def transform_kernel(x_ref, w_ref, o_ref):
    o_ref[...] = jnp.dot(
        x_ref[...], w_ref[...], preferred_element_type=jnp.float32
    ).astype(o_ref.dtype)


def transform_pallas(x, w, *, tile_m, out_dtype=jnp.bfloat16):
    """Z = x @ w, tiled over rows.  x: (Np, Fp) bf16, w: (Fp, Hp) bf16."""
    np_, fp = x.shape
    hp = w.shape[1]
    grid = (np_ // tile_m,)
    out_isz = jnp.dtype(out_dtype).itemsize

    vmem_need = 2 * (tile_m * fp * 2 + fp * hp * 2 + tile_m * hp * out_isz)
    flops = 2 * np_ * fp * hp
    bytes_accessed = x.size * 2 + w.size * 2 + np_ * hp * out_isz

    return pl.pallas_call(
        transform_kernel,
        out_shape=jax.ShapeDtypeStruct((np_, hp), out_dtype),
        grid_spec=pltpu.PrefetchScalarGridSpec(
            num_scalar_prefetch=0,
            grid=grid,
            in_specs=[
                pl.BlockSpec((tile_m, fp), lambda i: (i, 0)),   # Xs rows
                pl.BlockSpec((fp, hp), lambda i: (0, 0)),       # W (resident)
            ],
            out_specs=pl.BlockSpec((tile_m, hp), lambda i: (i, 0)),
        ),
        compiler_params=pltpu.CompilerParams(
            dimension_semantics=("parallel",),
            vmem_limit_bytes=_vmem_limit(vmem_need)),
        cost_estimate=pl.CostEstimate(
            flops=int(flops), transcendentals=0,
            bytes_accessed=int(bytes_accessed)),
    )(x, w)


# ---------------------------------------------------------------------------
# Kernel 2: aggregation  o[i] = [d*] act( d * ((A + I)[i,:] @ Z) + b )
# Grid = (row blocks i  [parallel], reduction blocks k  [arbitrary]).
# ---------------------------------------------------------------------------
def aggregate_kernel(a_ref, z_ref, b_ref, d_ref, o_ref, acc_ref, *,
                     apply_relu, prescale_by_d, tile_m, tile_k):
    i = pl.program_id(0)
    k = pl.program_id(1)

    @pl.when(k == 0)
    def _():
        acc_ref[...] = jnp.zeros_like(acc_ref)

    acc_ref[...] += jnp.dot(a_ref[...], z_ref[...],
                            preferred_element_type=jnp.float32)

    # Self-loop (the +I of A+I), added in-kernel so the dense A+I is never
    # built in HBM.  The identity rows for row block i live in Z block
    # k == i // blocks_per_k at sublane offset (i % blocks_per_k) * tile_m.
    blocks_per_k = tile_k // tile_m
    if blocks_per_k == 1:
        @pl.when(k == i)
        def _():
            acc_ref[...] += z_ref[...].astype(jnp.float32)
    else:
        @pl.when(k == i // blocks_per_k)
        def _():
            off = pl.multiple_of((i % blocks_per_k) * tile_m, tile_m)
            acc_ref[...] += z_ref[pl.ds(off, tile_m), :].astype(jnp.float32)

    @pl.when(k == pl.num_programs(1) - 1)
    def _():
        out = d_ref[...] * acc_ref[...] + b_ref[...]
        if apply_relu:
            out = jnp.maximum(out, 0.0)
        if prescale_by_d:
            # Fold the next layer's input-side D^-1/2 scaling into this
            # layer's finalize (saves one N x H HBM round trip); d == 0 on
            # padded rows, so padded-row garbage is zeroed here too.
            out = d_ref[...] * out
        o_ref[...] = out.astype(o_ref.dtype)


def aggregate_pallas(a, z, b, d, *, apply_relu, prescale_by_d, out_dtype,
                     tile_m, tile_k):
    """a: (Np,Np) bf16 raw adjacency (no self loops), z: (Np,Hp) bf16,
    b: (1,Hp) f32, d: (Np,1) f32."""
    np_ = a.shape[0]
    hp = z.shape[1]
    grid = (np_ // tile_m, np_ // tile_k)
    out_isz = jnp.dtype(out_dtype).itemsize

    vmem_need = (2 * (tile_m * tile_k * 2 + tile_k * hp * 2
                      + tile_m * hp * out_isz + hp * 4 + tile_m * 4)
                 + tile_m * hp * 4)                       # f32 accumulator
    flops = 2 * np_ * np_ * hp + 4 * np_ * hp
    bytes_accessed = (np_ * np_ * 2                        # A: streamed once
                      + grid[0] * np_ * hp * 2             # Z: once per row blk
                      + np_ * hp * out_isz + hp * 4 + np_ * 4)

    kernel = functools.partial(
        aggregate_kernel, apply_relu=apply_relu, prescale_by_d=prescale_by_d,
        tile_m=tile_m, tile_k=tile_k)

    return pl.pallas_call(
        kernel,
        out_shape=jax.ShapeDtypeStruct((np_, hp), out_dtype),
        grid_spec=pltpu.PrefetchScalarGridSpec(
            num_scalar_prefetch=0,
            grid=grid,
            in_specs=[
                pl.BlockSpec((tile_m, tile_k), lambda i, k: (i, k)),   # A tile
                pl.BlockSpec((tile_k, hp), lambda i, k: (k, 0)),       # Z tile
                pl.BlockSpec((1, hp), lambda i, k: (0, 0)),            # b
                pl.BlockSpec((tile_m, 1), lambda i, k: (i, 0)),        # d rows
            ],
            out_specs=pl.BlockSpec((tile_m, hp), lambda i, k: (i, 0)),
            scratch_shapes=[pltpu.VMEM((tile_m, hp), jnp.float32)],
        ),
        compiler_params=pltpu.CompilerParams(
            dimension_semantics=("parallel", "arbitrary"),
            vmem_limit_bytes=_vmem_limit(vmem_need)),
        cost_estimate=pl.CostEstimate(
            flops=int(flops), transcendentals=0,
            bytes_accessed=int(bytes_accessed)),
    )(a, z, b, d)


# ---------------------------------------------------------------------------
# Kernel 3: fully fused 2-layer GCN for tiny graphs (everything VMEM-resident,
# single launch) -- at grid (1,1) separate calls are pure launch/DMA overhead.
# ---------------------------------------------------------------------------
def fused_gcn_kernel(a_ref, xs_ref, w1_ref, b1_ref, w2_ref, b2_ref, d_ref,
                     o_ref):
    a = a_ref[...]
    d = d_ref[...]
    # Layer 1:  H = relu(d * ((A @ Z1) + Z1) + b1),   Z1 = Xs @ W1
    z1 = jnp.dot(xs_ref[...], w1_ref[...], preferred_element_type=jnp.float32)
    agg1 = jnp.dot(a, z1.astype(jnp.bfloat16),
                   preferred_element_type=jnp.float32) + z1
    h = jnp.maximum(d * agg1 + b1_ref[...], 0.0)
    # Layer 2:  out = d * ((A @ Z2) + Z2) + b2,       Z2 = (d * H) @ W2
    hs = (d * h).astype(jnp.bfloat16)
    z2 = jnp.dot(hs, w2_ref[...], preferred_element_type=jnp.float32)
    agg2 = jnp.dot(a, z2.astype(jnp.bfloat16),
                   preferred_element_type=jnp.float32) + z2
    o_ref[...] = (d * agg2 + b2_ref[...]).astype(o_ref.dtype)


def fused_gcn_pallas(a, xs, w1, b1, w2, b2, d):
    np_ = a.shape[0]
    fp = xs.shape[1]
    hp = w1.shape[1]
    cp = w2.shape[1]
    in_bytes = sum(int(t.size) * t.dtype.itemsize
                   for t in (a, xs, w1, b1, w2, b2, d))
    vmem_need = in_bytes + np_ * cp * 4 + 6 * np_ * max(hp, cp) * 4
    flops = 2 * np_ * (fp * hp + np_ * hp + hp * cp + np_ * cp)
    return pl.pallas_call(
        fused_gcn_kernel,
        out_shape=jax.ShapeDtypeStruct((np_, cp), jnp.float32),
        compiler_params=pltpu.CompilerParams(
            vmem_limit_bytes=_vmem_limit(vmem_need)),
        cost_estimate=pl.CostEstimate(
            flops=int(flops), transcendentals=0,
            bytes_accessed=int(in_bytes + np_ * cp * 4)),
    )(a, xs, w1, b1, w2, b2, d)


# ---------------------------------------------------------------------------
# Synthetic base model parameters + ModelWrapper-equivalent forward
# ---------------------------------------------------------------------------
def make_base_model_params(in_feats, hidden, out_feats, key):
    k1, k2, k3, k4 = jax.random.split(key, 4)
    w1 = jax.random.normal(k1, (in_feats, hidden), jnp.float32) * 0.1
    b1 = jax.random.normal(k2, (1, hidden), jnp.float32) * 0.01
    w2 = jax.random.normal(k3, (hidden, out_feats), jnp.float32) * 0.1
    b2 = jax.random.normal(k4, (1, out_feats), jnp.float32) * 0.01
    return dict(w1=w1, b1=b1, w2=w2, b2=b2)


def _pick_tiles(np128, tile_m, tile_k):
    tm = min(tile_m, np128)
    np_ = _round_up(np128, tm)
    tk = tm
    cand = max(tile_k, tm)
    while cand > tm:
        if np_ % cand == 0 and cand % tm == 0:
            tk = cand
            break
        cand //= 2
    return np_, tm, tk


def base_model(graph, features, params, *, tile_m=256, tile_k=512,
               fuse_threshold=256):
    """graph: dense (N, N) adjacency (0/1, no self loops); features: (N, F)."""
    n = graph.shape[0]
    f = features.shape[1]
    hid = params["w1"].shape[1]
    c = params["w2"].shape[1]

    fp = _round_up(f, 128)
    hp = _round_up(hid, 128)
    cp = _round_up(c, 128)
    np128 = _round_up(n, 128)

    fused = np128 <= fuse_threshold
    if fused:
        np_ = np128
        tm = tk = np128
    else:
        np_, tm, tk = _pick_tiles(np128, tile_m, tile_k)

    # Symmetric normalization vector d = (deg + 1)^-1/2.  The dense A + I /
    # A_norm are never built: +I is added in-kernel and the D^-1/2 scalings
    # are folded into X (input side) and the kernel finalize (output side).
    deg = jnp.sum(graph.astype(jnp.float32), axis=1) + 1.0
    d = jax.lax.rsqrt(deg)

    # Pad + cast in one pass per operand, directly to the streaming dtypes.
    # Padded rows/cols are zero so the valid region is exact (sliced at end).
    a_p = jnp.zeros((np_, np_), jnp.bfloat16).at[:n, :n].set(
        graph.astype(jnp.bfloat16))
    d_p = jnp.zeros((np_, 1), jnp.float32).at[:n, 0].set(d)
    xs_p = jnp.zeros((np_, fp), jnp.bfloat16).at[:n, :f].set(
        (d[:, None] * features.astype(jnp.float32)).astype(jnp.bfloat16))
    w1_p = jnp.zeros((fp, hp), jnp.bfloat16).at[:f, :hid].set(
        params["w1"].astype(jnp.bfloat16))
    b1_p = jnp.zeros((1, hp), jnp.float32).at[:, :hid].set(params["b1"])
    w2_p = jnp.zeros((hp, cp), jnp.bfloat16).at[:hid, :c].set(
        params["w2"].astype(jnp.bfloat16))
    b2_p = jnp.zeros((1, cp), jnp.float32).at[:, :c].set(params["b2"])

    if fused:
        out_p = fused_gcn_pallas(a_p, xs_p, w1_p, b1_p, w2_p, b2_p, d_p)
        return out_p[:n, :c]

    # Layer 1: transform hoisted out of the aggregation grid.
    z1 = transform_pallas(xs_p, w1_p, tile_m=tm)                  # (Np,Hp) bf16
    # Hs = d * relu(d * ((A + I) @ Z1) + b1)   (layer-2 input scaling folded in)
    hs = aggregate_pallas(a_p, z1, b1_p, d_p, apply_relu=True,
                          prescale_by_d=True, out_dtype=jnp.bfloat16,
                          tile_m=tm, tile_k=tk)
    # Layer 2.
    z2 = transform_pallas(hs, w2_p, tile_m=tm)                    # (Np,Cp) bf16
    out_p = aggregate_pallas(a_p, z2, b2_p, d_p, apply_relu=False,
                             prescale_by_d=False, out_dtype=jnp.float32,
                             tile_m=tm, tile_k=tk)
    return out_p[:n, :c]


def model_wrapper_forward(params, graph, features, feat=None, eweight=None):
    """Exact semantics of ModelWrapper.forward: feat / eweight are ignored."""
    del feat, eweight  # ignored, exactly as in the PyTorch wrapper
    return base_model(graph, features, params)


# ---------------------------------------------------------------------------
# Demo
# ---------------------------------------------------------------------------
if __name__ == "__main__":
    def reference(adj, x, p):
        n = adj.shape[0]
        a = adj + jnp.eye(n, dtype=jnp.float32)
        deg = jnp.sum(a, axis=1)
        dd = 1.0 / jnp.sqrt(jnp.maximum(deg, 1e-12))
        a_norm = a * dd[:, None] * dd[None, :]
        h1 = jnp.maximum(a_norm @ (x @ p["w1"]) + p["b1"], 0.0)
        return a_norm @ (h1 @ p["w2"]) + p["b2"]

    def make_graph(k, n):
        r = jax.random.uniform(k, (n, n))
        adj = (r + r.T > 1.0).astype(jnp.float32)
        return adj * (1.0 - jnp.eye(n, dtype=jnp.float32))

    forward = jax.jit(model_wrapper_forward)
    key = jax.random.PRNGKey(0)

    # Case 1: tiny graph (N=8) -> single fused, VMEM-resident kernel.
    kf, ka, kp, key = jax.random.split(key, 4)
    n1, f1, hid1, c1 = 8, 32, 32, 16
    feats1 = jax.random.normal(kf, (n1, f1), jnp.float32)
    adj1 = make_graph(ka, n1)
    params1 = make_base_model_params(f1, hid1, c1, kp)
    out1 = jax.block_until_ready(forward(params1, adj1, feats1))
    assert out1.shape == (n1, c1)
    assert jnp.allclose(out1, reference(adj1, feats1, params1),
                        atol=2e-2, rtol=2e-2)

    # Case 2: larger graph (N=300) -> tiled transform + aggregation kernels
    # (padded N = 512, row grid = 2 -> shards across v7x's 2 TensorCores).
    kf, ka, kp, key = jax.random.split(key, 4)
    n2, f2, hid2, c2 = 300, 64, 96, 10
    feats2 = jax.random.normal(kf, (n2, f2), jnp.float32)
    adj2 = make_graph(ka, n2)
    params2 = make_base_model_params(f2, hid2, c2, kp)
    out2 = jax.block_until_ready(forward(params2, adj2, feats2))
    assert out2.shape == (n2, c2)
    assert jnp.allclose(out2, reference(adj2, feats2, params2),
                        atol=2e-2, rtol=2e-2)

    print("KERNEL_OK")
</pallas_src>

<mosaic_0001>
module attributes {stable_mosaic.version = 11 : i64} {
  func.func @fused_gcn_kernel(%arg0: memref<128x128xbf16, #tpu.memory_space<vmem>>, %arg1: memref<128x128xbf16, #tpu.memory_space<vmem>>, %arg2: memref<128x128xbf16, #tpu.memory_space<vmem>>, %arg3: memref<1x128xf32, #tpu.memory_space<vmem>>, %arg4: memref<128x128xbf16, #tpu.memory_space<vmem>>, %arg5: memref<1x128xf32, #tpu.memory_space<vmem>>, %arg6: memref<128x1xf32, #tpu.memory_space<vmem>>, %arg7: memref<128x128xf32, #tpu.memory_space<vmem>>) attributes {dimension_semantics = [], scalar_prefetch = 0 : i64, scratch_operands = 0 : i64, tpu.core_type = #tpu.core_type<tc>} {
    %c0 = arith.constant 0 : index
    %c0_0 = arith.constant 0 : index
    %0 = vector.load %arg0[%c0, %c0_0] : memref<128x128xbf16, #tpu.memory_space<vmem>>, vector<128x128xbf16>
    %c0_1 = arith.constant 0 : index
    %c0_2 = arith.constant 0 : index
    %1 = vector.load %arg6[%c0_1, %c0_2] : memref<128x1xf32, #tpu.memory_space<vmem>>, vector<128x1xf32>
    %c0_3 = arith.constant 0 : index
    %c0_4 = arith.constant 0 : index
    %2 = vector.load %arg1[%c0_3, %c0_4] : memref<128x128xbf16, #tpu.memory_space<vmem>>, vector<128x128xbf16>
    %c0_5 = arith.constant 0 : index
    %c0_6 = arith.constant 0 : index
    %3 = vector.load %arg2[%c0_5, %c0_6] : memref<128x128xbf16, #tpu.memory_space<vmem>>, vector<128x128xbf16>
    %cst = arith.constant dense<0.000000e+00> : vector<128x128xf32>
    %4 = tpu.matmul %2, %3, %cst {dimension_numbers = #tpu.dot_dimension_numbers<[1], [0], [0], [1], [0, 0, 1, 1], [], []>} : vector<128x128xbf16>, vector<128x128xbf16>, vector<128x128xf32> -> vector<128x128xf32>
    %5 = arith.truncf %4 : vector<128x128xf32> to vector<128x128xbf16>
    %cst_7 = arith.constant dense<0.000000e+00> : vector<128x128xf32>
    %6 = tpu.matmul %0, %5, %cst_7 {dimension_numbers = #tpu.dot_dimension_numbers<[1], [0], [0], [1], [0, 0, 1, 1], [], []>} : vector<128x128xbf16>, vector<128x128xbf16>, vector<128x128xf32> -> vector<128x128xf32>
    %7 = arith.addf %6, %4 : vector<128x128xf32>
    %8 = vector.broadcast %1 : vector<128x1xf32> to vector<128x128xf32>
    %9 = arith.mulf %8, %7 : vector<128x128xf32>
    %c0_8 = arith.constant 0 : index
    %c0_9 = arith.constant 0 : index
    %10 = vector.load %arg3[%c0_8, %c0_9] : memref<1x128xf32, #tpu.memory_space<vmem>>, vector<1x128xf32>
    %11 = vector.broadcast %10 : vector<1x128xf32> to vector<128x128xf32>
    %12 = arith.addf %9, %11 : vector<128x128xf32>
    %cst_10 = arith.constant 0.000000e+00 : f32
    %13 = vector.broadcast %cst_10 : f32 to vector<128x128xf32>
    %14 = arith.maximumf %12, %13 : vector<128x128xf32>
    %15 = vector.broadcast %1 : vector<128x1xf32> to vector<128x128xf32>
    %16 = arith.mulf %15, %14 : vector<128x128xf32>
    %17 = arith.truncf %16 : vector<128x128xf32> to vector<128x128xbf16>
    %c0_11 = arith.constant 0 : index
    %c0_12 = arith.constant 0 : index
    %18 = vector.load %arg4[%c0_11, %c0_12] : memref<128x128xbf16, #tpu.memory_space<vmem>>, vector<128x128xbf16>
    %cst_13 = arith.constant dense<0.000000e+00> : vector<128x128xf32>
    %19 = tpu.matmul %17, %18, %cst_13 {dimension_numbers = #tpu.dot_dimension_numbers<[1], [0], [0], [1], [0, 0, 1, 1], [], []>} : vector<128x128xbf16>, vector<128x128xbf16>, vector<128x128xf32> -> vector<128x128xf32>
    %20 = arith.truncf %19 : vector<128x128xf32> to vector<128x128xbf16>
    %cst_14 = arith.constant dense<0.000000e+00> : vector<128x128xf32>
    %21 = tpu.matmul %0, %20, %cst_14 {dimension_numbers = #tpu.dot_dimension_numbers<[1], [0], [0], [1], [0, 0, 1, 1], [], []>} : vector<128x128xbf16>, vector<128x128xbf16>, vector<128x128xf32> -> vector<128x128xf32>
    %22 = arith.addf %21, %19 : vector<128x128xf32>
    %23 = vector.broadcast %1 : vector<128x1xf32> to vector<128x128xf32>
    %24 = arith.mulf %23, %22 : vector<128x128xf32>
    %c0_15 = arith.constant 0 : index
    %c0_16 = arith.constant 0 : index
    %25 = vector.load %arg5[%c0_15, %c0_16] : memref<1x128xf32, #tpu.memory_space<vmem>>, vector<1x128xf32>
    %26 = vector.broadcast %25 : vector<1x128xf32> to vector<128x128xf32>
    %27 = arith.addf %24, %26 : vector<128x128xf32>
    %c0_17 = arith.constant 0 : index
    %c0_18 = arith.constant 0 : index
    %28 = vector.load %arg7[%c0_17, %c0_18] : memref<128x128xf32, #tpu.memory_space<vmem>>, vector<128x128xf32>
    tpu.vector_store %arg7[%c0_17, %c0_18], %27 {strides = array<i32>} : memref<128x128xf32, #tpu.memory_space<vmem>>, vector<128x128xf32>,
    return
  }
}

</mosaic_0001>

<bundles_post_ra>
// kernel: model_wrapper_forward.1
= control target key start
LH: loop header
LB: loop body
LE: loop exit
PB: predicated region body
PF: predicated region fallthrough
CT: control target
= control target key end

     0   :  { %v888_v29 = vmov 0   ;;  %s1383_s2 = inlined_call_operand.vmem [shape: bf16[128,128], index: 2, kind: input, shape index: {}]   ;;  %s1384_s1 = inlined_call_operand.vmem [shape: bf16[128,128], index: 1, kind: input, shape index: {}]   ;;  %s1385_s6 = inlined_call_operand.vmem [shape: f32[128,1], index: 6, kind: input, shape index: {}]   ;;  %s1386_s3 = inlined_call_operand.vmem [shape: f32[1,128], index: 3, kind: input, shape index: {}]   ;;  %s1387_s0 = inlined_call_operand.vmem [shape: bf16[128,128], index: 0, kind: input, shape index: {}]   ;;  %s1388_s4 = inlined_call_operand.vmem [shape: bf16[128,128], index: 4, kind: input, shape index: {}]   ;;  %s1389_s5 = inlined_call_operand.vmem [shape: f32[1,128], index: 5, kind: input, shape index: {}]   ;;  %s1390_s7 = inlined_call_operand.vmem [shape: f32[128,128], index: 7, kind: output, shape index: {}]  }
   0x1   :  { %v873_v0 = vld [vmem:[%s1383_s2 + $0x38] sm:$0xff]  ;;  %v872_v1 = vld [vmem:[%s1383_s2 + $0x30] sm:$0xff]  ;;  %v871_v2 = vld [vmem:[%s1383_s2 + $0x28] sm:$0xff]  ;;  %883 = vset.pattern.permute.xlu0 %v888_v29  ;;  %884 = vset.pattern.permute.xlu1 %v888_v29 }
   0x2   :  { %186 = vmatpush.bf16.msra.mxu0 %v873_v0  ;;  %v870_v3 = vld [vmem:[%s1383_s2 + $0x20] sm:$0xff]  ;;  %v869_v4 = vld [vmem:[%s1383_s2 + $0x18] sm:$0xff]  ;;  %v868_v5 = vld [vmem:[%s1383_s2 + $0x10] sm:$0xff]  ;;  %885 = vset.pattern.permute.xlu2 %v888_v29 }
   0x3   :  { %v867_v6 = vld [vmem:[%s1383_s2 + $0x8] sm:$0xff]  ;;  %v866_v7 = vld [vmem:[%s1383_s2] sm:$0xff]  ;;  %v860_v10 = vld [vmem:[%s1384_s1 + $0x10] sm:$0xff] }
   0x4   :  { %v858_v8 = vld [vmem:[%s1384_s1] sm:$0xff]  ;;  %v859_v9 = vld [vmem:[%s1384_s1 + $0x8] sm:$0xff]  ;;  %v861_v11 = vld [vmem:[%s1384_s1 + $0x18] sm:$0xff] }
   0x5   :  { %v862_v12 = vld [vmem:[%s1384_s1 + $0x20] sm:$0xff]  ;;  %v863_v13 = vld [vmem:[%s1384_s1 + $0x28] sm:$0xff]  ;;  %v864_v14 = vld [vmem:[%s1384_s1 + $0x30] sm:$0xff] }
   0x6   :  { %187 = vmatpush.bf16.msra.mxu0 %v872_v1  ;;  %v865_v15 = vld [vmem:[%s1384_s1 + $0x38] sm:$0xff]  ;;  %v42_v28 = vld [vmem:[%s1385_s6] sm:$0xff]  ;;  %v43_v31 = vld [vmem:[%s1385_s6 + $0x8] sm:$0xff] }
   0x7   :  { %342 = vperm.xlu0 %883, %v42_v28   ;;  %v48_v33 = vld [vmem:[%s1385_s6 + $0x30] sm:$0xff]  ;;  %v51_v36 = vld [vmem:[%s1385_s6 + $0x48] sm:$0xff]  ;;  %v45_v39 = vld [vmem:[%s1385_s6 + $0x18] sm:$0xff] }
   0x8   :  { %v44_v35 = vld [vmem:[%s1385_s6 + $0x10] sm:$0xff]  ;;  %v54_v40 = vld [vmem:[%s1385_s6 + $0x60] sm:$0xff]  ;;  %v49_v43 = vld [vmem:[%s1385_s6 + $0x38] sm:$0xff] }
   0x9   :  { %352 = vperm.xlu1 %884, %v44_v35   ;;  %v57_v44 = vld [vmem:[%s1385_s6 + $0x78] sm:$0xff]  ;;  %v52_v47 = vld [vmem:[%s1385_s6 + $0x50] sm:$0xff]  ;;  %v55_v50 = vld [vmem:[%s1385_s6 + $0x68] sm:$0xff] }
   0xa   :  { %188 = vmatpush.bf16.msra.mxu0 %v871_v2  ;;  %v1061_v52 = vld [vmem:[%s1387_s0] sm:$0xff]  ;;  %v47_v54 = vld [vmem:[%s1385_s6 + $0x28] sm:$0xff]  ;;  %v53_v57 = vld [vmem:[%s1385_s6 + $0x58] sm:$0xff] }
   0xb   :  { %v46_v53 = vld [vmem:[%s1385_s6 + $0x20] sm:$0xff]  ;;  %v1073_v55 = vld [vmem:[%s1387_s0 + $0x8] sm:$0xff]  ;;  %v1085_v58 = vld [vmem:[%s1387_s0 + $0x10] sm:$0xff] }
   0xc   :  { %362 = vperm.xlu2 %885, %v46_v53   ;;  %v50_v56 = vld [vmem:[%s1385_s6 + $0x40] sm:$0xff]  ;;  %v56_v59 = vld [vmem:[%s1385_s6 + $0x70] sm:$0xff]  ;;  %v1094_v60 = vld [vmem:[%s1387_s0 + $0x18] sm:$0xff] }
   0xd   :  { %v1100_v61 = vld [vmem:[%s1387_s0 + $0x20] sm:$0xff]  ;;  %v1106_v62 = vld [vmem:[%s1387_s0 + $0x28] sm:$0xff]  ;;  %v881_v63 = vld [vmem:[%s1388_s4 + $0x38] sm:$0xff] }
   0xe   :  { %189 = vmatpush.bf16.msra.mxu0 %v870_v3  ;;  %560 = vmatpush.bf16.msra.mxu2 %v881_v63  ;;  %v880_v0 = vld [vmem:[%s1388_s4 + $0x30] sm:$0xff]  ;;  %v879_v1 = vld [vmem:[%s1388_s4 + $0x28] sm:$0xff]  ;;  %v878_v3 = vld [vmem:[%s1388_s4 + $0x20] sm:$0xff] }
   0xf   :  { %347 = vperm.xlu0 %883, %v43_v31   ;;  %v1121_v2 = vld [vmem:[%s1387_s0 + $0x30] sm:$0xff] }
  0x11   :  { %357 = vperm.xlu1 %884, %v45_v39  }
  0x12   :  { %190 = vmatpush.bf16.msra.mxu0 %v869_v4  ;;  %561 = vmatpush.bf16.msra.mxu2 %v880_v0  ;;  %v877_v4 = vld [vmem:[%s1388_s4 + $0x18] sm:$0xff] }
  0x14   :  { %367 = vperm.xlu2 %885, %v47_v54  }
  0x16   :  { %191 = vmatpush.bf16.msra.mxu0 %v868_v5  ;;  %562 = vmatpush.bf16.msra.mxu2 %v879_v1  ;;  %v876_v5 = vld [vmem:[%s1388_s4 + $0x10] sm:$0xff] }
  0x17   :  { %372 = vperm.xlu0 %883, %v48_v33  }
  0x19   :  { %377 = vperm.xlu1 %884, %v49_v43  }
  0x1a   :  { %192 = vmatpush.bf16.msra.mxu0 %v867_v6  ;;  %563 = vmatpush.bf16.msra.mxu2 %v878_v3  ;;  %v875_v6 = vld [vmem:[%s1388_s4 + $0x8] sm:$0xff] }
  0x1c   :  { %382 = vperm.xlu2 %885, %v50_v56  }
  0x1e   :  { %193 = vmatpush.bf16.msra.mxu0 %v866_v7  ;;  %564 = vmatpush.bf16.msra.mxu2 %v877_v4  ;;  %v1139_v7 = vld [vmem:[%s1387_s0 + $0x38] sm:$0xff] }
  0x1f   :  { %387 = vperm.xlu0 %883, %v51_v36  }
  0x21   :  { %194 = vmatmul.bf16.vlgmr.msra.gmra.mxu0 %v858_v8  ;;  %392 = vperm.xlu1 %884, %v52_v47   ;;  %v874_v8 = vld [vmem:[%s1388_s4] sm:$0xff] }
  0x22   :  { %565 = vmatpush.bf16.msra.mxu2 %v876_v5 }
  0x24   :  { %397 = vperm.xlu2 %885, %v53_v57  }
  0x26   :  { %566 = vmatpush.bf16.msra.mxu2 %v875_v6 }
  0x27   :  { %402 = vperm.xlu0 %883, %v54_v40  }
  0x29   :  { %407 = vperm.xlu1 %884, %v55_v50  }
  0x2a   :  { %567 = vmatpush.bf16.msra.mxu2 %v874_v8 }
  0x2c   :  { %412 = vperm.xlu2 %885, %v56_v59  }
  0x2f   :  { %417 = vperm.xlu0 %883, %v57_v44  }
  0x31   :  { %199 = vmatmul.bf16.gmra.mxu0 %v859_v9 }
  0x41   :  { %204 = vmatmul.bf16.gmra.mxu0 %v860_v10 }
  0x51   :  { %209 = vmatmul.bf16.gmra.mxu0 %v861_v11 }
  0x61   :  { %214 = vmatmul.bf16.gmra.mxu0 %v862_v12 }
  0x66   :  { %v1172_v50 = vpop.permute.xlu2 %362 }
  0x6e   :  { %v1180_v1 = vpop.permute.xlu2 %367 }
  0x71   :  { %219 = vmatmul.bf16.gmra.mxu0 %v863_v13  ;;  %v1152_v13 = vld [vmem:[%s1386_s3] ss:$0 sm:$0xff] }
  0x79   :  { %v1145_v9 = vpop.permute.xlu0 %342 }
  0x7b   :  { %v1160_v36 = vpop.permute.xlu1 %352 }
  0x81   :  { %224 = vmatmul.bf16.gmra.mxu0 %v864_v14  ;;  %v1156_v29 = vpop.permute.xlu0 %347 }
  0x91   :  { %229 = vmatmul.bf16.gmra.mxu0 %v865_v15 }
  0x9e   :  { %v977_v16 = vpop.f32.mrf.mxu0 }
  0xa6   :  { %v979_v17 = vpop.f32.mrf.mxu0 }
  0xa7   :  { %v235_v51 = vpack.c.bf16 %v979_v17, %v977_v16 }
  0xae   :  { %v981_v18 = vpop.f32.mrf.mxu0 }
  0xb6   :  { %v983_v19 = vpop.f32.mrf.mxu0 }
  0xb7   :  { %v236_v49 = vpack.c.bf16 %v983_v19, %v981_v18 }
  0xbe   :  { %v985_v20 = vpop.f32.mrf.mxu0 }
  0xc6   :  { %v987_v21 = vpop.f32.mrf.mxu0 }
  0xc7   :  { %v237_v48 = vpack.c.bf16 %v987_v21, %v985_v20 }
  0xce   :  { %v989_v22 = vpop.f32.mrf.mxu0 }
  0xd6   :  { %v991_v23 = vpop.f32.mrf.mxu0 }
  0xd7   :  { %v238_v46 = vpack.c.bf16 %v991_v23, %v989_v22 }
  0xde   :  { %v993_v24 = vpop.f32.mrf.mxu0 }
  0xe6   :  { %v995_v25 = vpop.f32.mrf.mxu0 }
  0xe7   :  { %v239_v45 = vpack.c.bf16 %v995_v25, %v993_v24 }
  0xee   :  { %v997_v26 = vpop.f32.mrf.mxu0 }
  0xf6   :  { %v999_v27 = vpop.f32.mrf.mxu0 }
  0xf7   :  { %v240_v42 = vpack.c.bf16 %v999_v27, %v997_v26 }
  0xfe   :  { %v1004_v30 = vpop.f32.mrf.mxu0 }
 0x106   :  { %v1009_v32 = vpop.f32.mrf.mxu0 }
 0x107   :  { %v241_v41 = vpack.c.bf16 %v1009_v32, %v1004_v30 }
 0x10e   :  { %v1014_v34 = vpop.f32.mrf.mxu0 }
 0x116   :  { %v1022_v37 = vpop.f32.mrf.mxu0 }
 0x117   :  { %v242_v38 = vpack.c.bf16 %v1022_v37, %v1014_v34 }
 0x119   :  { %291 = vmatpush.bf16.msra.mxu1 %v242_v38 }
 0x11d   :  { %292 = vmatpush.bf16.msra.mxu1 %v241_v41 }
 0x121   :  { %293 = vmatpush.bf16.msra.mxu1 %v240_v42 }
 0x125   :  { %294 = vmatpush.bf16.msra.mxu1 %v239_v45 }
 0x129   :  { %295 = vmatpush.bf16.msra.mxu1 %v238_v46  ;;  %v1168_v46 = vpop.permute.xlu1 %357 }
 0x12d   :  { %296 = vmatpush.bf16.msra.mxu1 %v237_v48 }
 0x131   :  { %297 = vmatpush.bf16.msra.mxu1 %v236_v49 }
 0x135   :  { %298 = vmatpush.bf16.msra.mxu1 %v235_v51 }
 0x138   :  { %299 = vmatmul.bf16.vlgmr.msra.gmra.mxu1 %v1061_v52 }
 0x148   :  { %304 = vmatmul.bf16.gmra.mxu1 %v1073_v55 }
 0x158   :  { %309 = vmatmul.bf16.gmra.mxu1 %v1085_v58 }
 0x168   :  { %314 = vmatmul.bf16.gmra.mxu1 %v1094_v60 }
 0x178   :  { %319 = vmatmul.bf16.gmra.mxu1 %v1100_v61 }
 0x188   :  { %324 = vmatmul.bf16.gmra.mxu1 %v1106_v62 }
 0x198   :  { %329 = vmatmul.bf16.gmra.mxu1 %v1121_v2 }
 0x1a8   :  { %334 = vmatmul.bf16.gmra.mxu1 %v1139_v7 }
 0x1b5   :  { %v300_v10 = vpop.f32.mrf.mxu1 }
 0x1b6   :  { %v301_v11 = vadd.f32 %v300_v10, %v977_v16 }
 0x1b8   :  { %v420_v12 = vmul.f32 %v1145_v9, %v301_v11 }
 0x1ba   :  { %v440_v15 = vadd.f32 %v1152_v13, %v420_v12 }
 0x1bc   :  { %v456_v33 = vmax.f32 %v440_v15, 0.0 }
 0x1bd   :  { %v302_v14 = vpop.f32.mrf.mxu1 }
 0x1be   :  { %v303_v28 = vadd.f32 %v302_v14, %v979_v17  ;;  %v472_v40 = vmul.f32 %v456_v33, %v1145_v9  ;;  %v1187_v14 = vpop.permute.xlu0 %372  ;;  %v1192_v33 = vpop.permute.xlu1 %377 }
 0x1c0   :  { %v421_v31 = vmul.f32 %v1156_v29, %v303_v28 }
 0x1c2   :  { %v441_v35 = vadd.f32 %v1152_v13, %v421_v31 }
 0x1c4   :  { %v457_v16 = vmax.f32 %v441_v35, 0.0 }
 0x1c5   :  { %v305_v38 = vpop.f32.mrf.mxu1 }
 0x1c6   :  { %v306_v39 = vadd.f32 %v305_v38, %v981_v18  ;;  %v473_v41 = vmul.f32 %v457_v16, %v1156_v29 }
 0x1c8   :  { %v488_v42 = vpack.c.bf16 %v473_v41, %v472_v40  ;;  %v422_v17 = vmul.f32 %v1160_v36, %v306_v39 }
 0x1ca   :  { %568 = vmatmul.bf16.vlgmr.msra.gmra.mxu2 %v488_v42  ;;  %v442_v44 = vadd.f32 %v1152_v13, %v422_v17 }
 0x1cc   :  { %v458_v48 = vmax.f32 %v442_v44, 0.0 }
 0x1cd   :  { %v307_v43 = vpop.f32.mrf.mxu1 }
 0x1ce   :  { %v308_v45 = vadd.f32 %v307_v43, %v983_v19  ;;  %v474_v54 = vmul.f32 %v458_v48, %v1160_v36  ;;  %v1199_v43 = vpop.permute.xlu2 %382  ;;  %v1204_v48 = vpop.permute.xlu0 %387 }
 0x1d0   :  { %v423_v47 = vmul.f32 %v1168_v46, %v308_v45 }
 0x1d2   :  { %v443_v18 = vadd.f32 %v1152_v13, %v423_v47 }
 0x1d4   :  { %v459_v49 = vmax.f32 %v443_v18, 0.0 }
 0x1d5   :  { %v310_v51 = vpop.f32.mrf.mxu1 }
 0x1d6   :  { %v311_v53 = vadd.f32 %v310_v51, %v985_v20  ;;  %v475_v56 = vmul.f32 %v459_v49, %v1168_v46 }
 0x1d8   :  { %v489_v57 = vpack.c.bf16 %v475_v56, %v474_v54  ;;  %v424_v19 = vmul.f32 %v1172_v50, %v311_v53 }
 0x1da   :  { %573 = vmatmul.bf16.gmra.mxu2 %v489_v57  ;;  %v444_v63 = vadd.f32 %v1152_v13, %v424_v19 }
 0x1dc   :  { %v460_v4 = vmax.f32 %v444_v63, 0.0 }
 0x1dd   :  { %v312_v59 = vpop.f32.mrf.mxu1 }
 0x1de   :  { %v313_v0 = vadd.f32 %v312_v59, %v987_v21  ;;  %v476_v10 = vmul.f32 %v460_v4, %v1172_v50  ;;  %v1211_v59 = vpop.permute.xlu1 %392  ;;  %v1216_v4 = vpop.permute.xlu2 %397 }
 0x1e0   :  { %v425_v3 = vmul.f32 %v1180_v1, %v313_v0 }
 0x1e2   :  { %v445_v20 = vadd.f32 %v1152_v13, %v425_v3 }
 0x1e4   :  { %v461_v5 = vmax.f32 %v445_v20, 0.0 }
 0x1e5   :  { %v315_v6 = vpop.f32.mrf.mxu1 }
 0x1e6   :  { %v316_v8 = vadd.f32 %v315_v6, %v989_v22  ;;  %v477_v11 = vmul.f32 %v461_v5, %v1180_v1 }
 0x1e8   :  { %v490_v12 = vpack.c.bf16 %v477_v11, %v476_v10  ;;  %v426_v21 = vmul.f32 %v1187_v14, %v316_v8 }
 0x1ea   :  { %578 = vmatmul.bf16.gmra.mxu2 %v490_v12  ;;  %v446_v28 = vadd.f32 %v1152_v13, %v426_v21 }
 0x1ec   :  { %v462_v22 = vmax.f32 %v446_v28, 0.0 }
 0x1ed   :  { %v317_v15 = vpop.f32.mrf.mxu1 }
 0x1ee   :  { %v318_v31 = vadd.f32 %v317_v15, %v991_v23  ;;  %v478_v41 = vmul.f32 %v462_v22, %v1187_v14  ;;  %v1223_v15 = vpop.permute.xlu0 %402  ;;  %v1228_v22 = vpop.permute.xlu1 %407 }
 0x1f0   :  { %v427_v35 = vmul.f32 %v1192_v33, %v318_v31 }
 0x1f2   :  { %v447_v16 = vadd.f32 %v1152_v13, %v427_v35 }
 0x1f4   :  { %v463_v38 = vmax.f32 %v447_v16, 0.0 }
 0x1f5   :  { %v320_v39 = vpop.f32.mrf.mxu1 }
 0x1f6   :  { %v321_v40 = vadd.f32 %v320_v39, %v993_v24  ;;  %v479_v42 = vmul.f32 %v463_v38, %v1192_v33 }
 0x1f8   :  { %v491_v17 = vpack.c.bf16 %v479_v42, %v478_v41  ;;  %v428_v23 = vmul.f32 %v1199_v43, %v321_v40 }
 0x1fa   :  { %583 = vmatmul.bf16.gmra.mxu2 %v491_v17  ;;  %v448_v45 = vadd.f32 %v1152_v13, %v428_v23 }
 0x1fc   :  { %v464_v24 = vmax.f32 %v448_v45, 0.0 }
 0x1fd   :  { %v322_v44 = vpop.f32.mrf.mxu1 }
 0x1fe   :  { %v323_v47 = vadd.f32 %v322_v44, %v995_v25  ;;  %v480_v56 = vmul.f32 %v464_v24, %v1199_v43  ;;  %v1235_v44 = vpop.permute.xlu2 %412  ;;  %v1240_v24 = vpop.permute.xlu0 %417 }
 0x200   :  { %v429_v18 = vmul.f32 %v1204_v48, %v323_v47 }
 0x202   :  { %v449_v49 = vadd.f32 %v1152_v13, %v429_v18 }
 0x204   :  { %v465_v51 = vmax.f32 %v449_v49, 0.0 }
 0x205   :  { %v325_v53 = vpop.f32.mrf.mxu1 }
 0x206   :  { %v326_v54 = vadd.f32 %v325_v53, %v997_v26  ;;  %v481_v57 = vmul.f32 %v465_v51, %v1204_v48 }
 0x208   :  { %v492_v19 = vpack.c.bf16 %v481_v57, %v480_v56  ;;  %v430_v25 = vmul.f32 %v1211_v59, %v326_v54 }
 0x20a   :  { %588 = vmatmul.bf16.gmra.mxu2 %v492_v19  ;;  %v450_v0 = vadd.f32 %v1152_v13, %v430_v25 }
 0x20c   :  { %v466_v26 = vmax.f32 %v450_v0, 0.0 }
 0x20d   :  { %v327_v63 = vpop.f32.mrf.mxu1 }
 0x20e   :  { %v328_v3 = vadd.f32 %v327_v63, %v999_v27  ;;  %v482_v11 = vmul.f32 %v466_v26, %v1211_v59 }
 0x210   :  { %v431_v20 = vmul.f32 %v1216_v4, %v328_v3 }
 0x212   :  { %v451_v5 = vadd.f32 %v1152_v13, %v431_v20 }
 0x214   :  { %v467_v6 = vmax.f32 %v451_v5, 0.0 }
 0x215   :  { %v330_v8 = vpop.f32.mrf.mxu1 }
 0x216   :  { %v331_v10 = vadd.f32 %v330_v8, %v1004_v30  ;;  %v483_v12 = vmul.f32 %v467_v6, %v1216_v4 }
 0x218   :  { %v493_v21 = vpack.c.bf16 %v483_v12, %v482_v11  ;;  %v432_v27 = vmul.f32 %v1223_v15, %v331_v10 }
 0x21a   :  { %593 = vmatmul.bf16.gmra.mxu2 %v493_v21  ;;  %v452_v31 = vadd.f32 %v1152_v13, %v432_v27 }
 0x21c   :  { %v468_v30 = vmax.f32 %v452_v31, 0.0 }
 0x21d   :  { %v332_v28 = vpop.f32.mrf.mxu1 }
 0x21e   :  { %v333_v35 = vadd.f32 %v332_v28, %v1009_v32  ;;  %v484_v42 = vmul.f32 %v468_v30, %v1223_v15 }
 0x220   :  { %v433_v16 = vmul.f32 %v1228_v22, %v333_v35 }
 0x222   :  { %v453_v38 = vadd.f32 %v1152_v13, %v433_v16 }
 0x224   :  { %v469_v39 = vmax.f32 %v453_v38, 0.0 }
 0x225   :  { %v335_v40 = vpop.f32.mrf.mxu1 }
 0x226   :  { %v336_v41 = vadd.f32 %v335_v40, %v1014_v34  ;;  %v485_v17 = vmul.f32 %v469_v39, %v1228_v22 }
 0x228   :  { %v494_v23 = vpack.c.bf16 %v485_v17, %v484_v42  ;;  %v434_v32 = vmul.f32 %v1235_v44, %v336_v41 }
 0x22a   :  { %598 = vmatmul.bf16.gmra.mxu2 %v494_v23  ;;  %v454_v47 = vadd.f32 %v1152_v13, %v434_v32 }
 0x22c   :  { %v470_v34 = vmax.f32 %v454_v47, 0.0 }
 0x22d   :  { %v337_v45 = vpop.f32.mrf.mxu1 }
 0x22e   :  { %v338_v18 = vadd.f32 %v337_v45, %v1022_v37  ;;  %v486_v54 = vmul.f32 %v470_v34, %v1235_v44 }
 0x230   :  { %v435_v49 = vmul.f32 %v1240_v24, %v338_v18 }
 0x232   :  { %v455_v51 = vadd.f32 %v1152_v13, %v435_v49 }
 0x234   :  { %v471_v53 = vmax.f32 %v455_v51, 0.0 }
 0x236   :  { %v487_v56 = vmul.f32 %v471_v53, %v1240_v24 }
 0x238   :  { %v495_v57 = vpack.c.bf16 %v487_v56, %v486_v54 }
 0x23a   :  { %603 = vmatmul.bf16.gmra.mxu2 %v495_v57 }
 0x24d   :  { %v569_v19 = vpop.f32.mrf.mxu2 }
 0x255   :  { %v571_v25 = vpop.f32.mrf.mxu2 }
 0x256   :  { %v609_v39 = vpack.c.bf16 %v571_v25, %v569_v19 }
 0x25d   :  { %v574_v63 = vpop.f32.mrf.mxu2 }
 0x265   :  { %v576_v0 = vpop.f32.mrf.mxu2 }
 0x266   :  { %v610_v38 = vpack.c.bf16 %v576_v0, %v574_v63 }
 0x26d   :  { %v579_v3 = vpop.f32.mrf.mxu2 }
 0x275   :  { %v1246_v37 = vpop.f32.mrf.mxu2 }
 0x276   :  { %v611_v30 = vpack.c.bf16 %v1246_v37, %v579_v3 }
 0x27d   :  { %v1248_v20 = vpop.f32.mrf.mxu2 }
 0x285   :  { %v1250_v26 = vpop.f32.mrf.mxu2 }
 0x286   :  { %v612_v16 = vpack.c.bf16 %v1250_v26, %v1248_v20 }
 0x28d   :  { %v1252_v5 = vpop.f32.mrf.mxu2 }
 0x295   :  { %v1254_v13 = vpop.f32.mrf.mxu2 }
 0x296   :  { %v613_v35 = vpack.c.bf16 %v1254_v13, %v1252_v5 }
 0x29d   :  { %v1256_v6 = vpop.f32.mrf.mxu2 }
 0x2a5   :  { %v1258_v8 = vpop.f32.mrf.mxu2 }
 0x2a6   :  { %v614_v31 = vpack.c.bf16 %v1258_v8, %v1256_v6 }
 0x2ad   :  { %v1260_v10 = vpop.f32.mrf.mxu2 }
 0x2b5   :  { %v1262_v11 = vpop.f32.mrf.mxu2 }
 0x2b6   :  { %v615_v28 = vpack.c.bf16 %v1262_v11, %v1260_v10 }
 0x2bd   :  { %v1264_v12 = vpop.f32.mrf.mxu2 }
 0x2c5   :  { %v1266_v21 = vpop.f32.mrf.mxu2 }
 0x2c6   :  { %v616_v27 = vpack.c.bf16 %v1266_v21, %v1264_v12 }
 0x2c8   :  { %617 = vmatpush.bf16.msra.mxu3 %v616_v27 }
 0x2cc   :  { %618 = vmatpush.bf16.msra.mxu3 %v615_v28 }
 0x2d0   :  { %619 = vmatpush.bf16.msra.mxu3 %v614_v31 }
 0x2d4   :  { %620 = vmatpush.bf16.msra.mxu3 %v613_v35 }
 0x2d8   :  { %621 = vmatpush.bf16.msra.mxu3 %v612_v16 }
 0x2dc   :  { %622 = vmatpush.bf16.msra.mxu3 %v611_v30 }
 0x2e0   :  { %623 = vmatpush.bf16.msra.mxu3 %v610_v38 }
 0x2e4   :  { %624 = vmatpush.bf16.msra.mxu3 %v609_v39 }
 0x2e7   :  { %625 = vmatmul.bf16.vlgmr.msra.gmra.mxu3 %v1061_v52  ;;  %v1290_v52 = vld [vmem:[%s1389_s5] ss:$0 sm:$0xff] }
 0x2f7   :  { %630 = vmatmul.bf16.gmra.mxu3 %v1073_v55 }
 0x307   :  { %635 = vmatmul.bf16.gmra.mxu3 %v1085_v58 }
 0x317   :  { %640 = vmatmul.bf16.gmra.mxu3 %v1094_v60 }
 0x327   :  { %645 = vmatmul.bf16.gmra.mxu3 %v1100_v61 }
 0x337   :  { %650 = vmatmul.bf16.gmra.mxu3 %v1106_v62 }
 0x347   :  { %655 = vmatmul.bf16.gmra.mxu3 %v1121_v2 }
 0x357   :  { %660 = vmatmul.bf16.gmra.mxu3 %v1139_v7 }
 0x36a   :  { %v626_v40 = vpop.f32.mrf.mxu3 }
 0x36b   :  { %v627_v41 = vadd.f32 %v626_v40, %v569_v19 }
 0x36d   :  { %v666_v55 = vmul.f32 %v627_v41, %v1145_v9 }
 0x36f   :  { %v686_v58 = vadd.f32 %v1290_v52, %v666_v55 }
 0x371   :  { %702 = vst [vmem:[%s1390_s7] sm:$0xff] %v686_v58 }
 0x372   :  { %v628_v60 = vpop.f32.mrf.mxu3 }
 0x373   :  { %v629_v61 = vadd.f32 %v628_v60, %v571_v25 }
 0x375   :  { %v667_v62 = vmul.f32 %v629_v61, %v1156_v29 }
 0x377   :  { %v687_v2 = vadd.f32 %v1290_v52, %v667_v62 }
 0x379   :  { %703 = vst [vmem:[%s1390_s7 + $0x8] sm:$0xff] %v687_v2 }
 0x37a   :  { %v631_v7 = vpop.f32.mrf.mxu3 }
 0x37b   :  { %v632_v42 = vadd.f32 %v631_v7, %v574_v63 }
 0x37d   :  { %v668_v9 = vmul.f32 %v632_v42, %v1160_v36 }
 0x37f   :  { %v688_v17 = vadd.f32 %v1290_v52, %v668_v9 }
 0x381   :  { %704 = vst [vmem:[%s1390_s7 + $0x10] sm:$0xff] %v688_v17 }
 0x382   :  { %v633_v23 = vpop.f32.mrf.mxu3 }
 0x383   :  { %v634_v32 = vadd.f32 %v633_v23, %v576_v0 }
 0x385   :  { %v669_v29 = vmul.f32 %v634_v32, %v1168_v46 }
 0x387   :  { %v689_v45 = vadd.f32 %v1290_v52, %v669_v29 }
 0x389   :  { %705 = vst [vmem:[%s1390_s7 + $0x18] sm:$0xff] %v689_v45 }
 0x38a   :  { %v636_v47 = vpop.f32.mrf.mxu3 }
 0x38b   :  { %v637_v18 = vadd.f32 %v636_v47, %v579_v3 }
 0x38d   :  { %v670_v36 = vmul.f32 %v637_v18, %v1172_v50 }
 0x38f   :  { %v690_v49 = vadd.f32 %v1290_v52, %v670_v36 }
 0x391   :  { %706 = vst [vmem:[%s1390_s7 + $0x20] sm:$0xff] %v690_v49 }
 0x392   :  { %v638_v34 = vpop.f32.mrf.mxu3 }
 0x393   :  { %v639_v51 = vadd.f32 %v638_v34, %v1246_v37 }
 0x395   :  { %v671_v46 = vmul.f32 %v639_v51, %v1180_v1 }
 0x397   :  { %v691_v53 = vadd.f32 %v1290_v52, %v671_v46 }
 0x399   :  { %707 = vst [vmem:[%s1390_s7 + $0x28] sm:$0xff] %v691_v53 }
 0x39a   :  { %v641_v54 = vpop.f32.mrf.mxu3 }
 0x39b   :  { %v642_v50 = vadd.f32 %v641_v54, %v1248_v20 }
 0x39d   :  { %v672_v56 = vmul.f32 %v642_v50, %v1187_v14 }
 0x39f   :  { %v692_v57 = vadd.f32 %v1290_v52, %v672_v56 }
 0x3a1   :  { %708 = vst [vmem:[%s1390_s7 + $0x30] sm:$0xff] %v692_v57 }
 0x3a2   :  { %v643_v19 = vpop.f32.mrf.mxu3 }
 0x3a3   :  { %v644_v1 = vadd.f32 %v643_v19, %v1250_v26 }
 0x3a5   :  { %v673_v25 = vmul.f32 %v644_v1, %v1192_v33 }
 0x3a7   :  { %v693_v63 = vadd.f32 %v1290_v52, %v673_v25 }
 0x3a9   :  { %709 = vst [vmem:[%s1390_s7 + $0x38] sm:$0xff] %v693_v63 }
 0x3aa   :  { %v646_v0 = vpop.f32.mrf.mxu3 }
 0x3ab   :  { %v647_v14 = vadd.f32 %v646_v0, %v1252_v5 }
 0x3ad   :  { %v674_v3 = vmul.f32 %v647_v14, %v1199_v43 }
 0x3af   :  { %v694_v37 = vadd.f32 %v1290_v52, %v674_v3 }
 0x3b1   :  { %710 = vst [vmem:[%s1390_s7 + $0x40] sm:$0xff] %v694_v37 }
 0x3b2   :  { %v648_v20 = vpop.f32.mrf.mxu3 }
 0x3b3   :  { %v649_v33 = vadd.f32 %v648_v20, %v1254_v13 }
 0x3b5   :  { %v675_v26 = vmul.f32 %v649_v33, %v1204_v48 }
 0x3b7   :  { %v695_v27 = vadd.f32 %v1290_v52, %v675_v26 }
 0x3b9   :  { %711 = vst [vmem:[%s1390_s7 + $0x48] sm:$0xff] %v695_v27 }
 0x3ba   :  { %v651_v5 = vpop.f32.mrf.mxu3 }
 0x3bb   :  { %v652_v43 = vadd.f32 %v651_v5, %v1256_v6 }
 0x3bd   :  { %v676_v28 = vmul.f32 %v652_v43, %v1211_v59 }
 0x3bf   :  { %v696_v31 = vadd.f32 %v1290_v52, %v676_v28 }
 0x3c1   :  { %712 = vst [vmem:[%s1390_s7 + $0x50] sm:$0xff] %v696_v31 }
 0x3c2   :  { %v653_v13 = vpop.f32.mrf.mxu3 }
 0x3c3   :  { %v654_v48 = vadd.f32 %v653_v13, %v1258_v8 }
 0x3c5   :  { %v677_v35 = vmul.f32 %v654_v48, %v1216_v4 }
 0x3c7   :  { %v697_v16 = vadd.f32 %v1290_v52, %v677_v35 }
 0x3c9   :  { %713 = vst [vmem:[%s1390_s7 + $0x58] sm:$0xff] %v697_v16 }
 0x3ca   :  { %v656_v6 = vpop.f32.mrf.mxu3 }
 0x3cb   :  { %v657_v59 = vadd.f32 %v656_v6, %v1260_v10 }
 0x3cd   :  { %v678_v30 = vmul.f32 %v657_v59, %v1223_v15 }
 0x3cf   :  { %v698_v38 = vadd.f32 %v1290_v52, %v678_v30 }
 0x3d1   :  { %714 = vst [vmem:[%s1390_s7 + $0x60] sm:$0xff] %v698_v38 }
 0x3d2   :  { %v658_v8 = vpop.f32.mrf.mxu3 }
 0x3d3   :  { %v659_v4 = vadd.f32 %v658_v8, %v1262_v11 }
 0x3d5   :  { %v679_v39 = vmul.f32 %v659_v4, %v1228_v22 }
 0x3d7   :  { %v699_v40 = vadd.f32 %v1290_v52, %v679_v39 }
 0x3d9   :  { %715 = vst [vmem:[%s1390_s7 + $0x68] sm:$0xff] %v699_v40 }
 0x3da   :  { %v661_v10 = vpop.f32.mrf.mxu3 }
 0x3db   :  { %v662_v15 = vadd.f32 %v661_v10, %v1264_v12 }
 0x3dd   :  { %v680_v41 = vmul.f32 %v662_v15, %v1235_v44 }
 0x3df   :  { %v700_v55 = vadd.f32 %v1290_v52, %v680_v41 }
 0x3e1   :  { %716 = vst [vmem:[%s1390_s7 + $0x70] sm:$0xff] %v700_v55 }
 0x3e2   :  { %v663_v11 = vpop.f32.mrf.mxu3 }
 0x3e3   :  { %v664_v22 = vadd.f32 %v663_v11, %v1266_v21 }
 0x3e5   :  { %v681_v58 = vmul.f32 %v664_v22, %v1240_v24 }
 0x3e7   :  { %v701_v60 = vadd.f32 %v1290_v52, %v681_v58 }
 0x3e9   :  { %717 = vst [vmem:[%s1390_s7 + $0x78] sm:$0xff] %v701_v60 }

</bundles_post_ra>
